<compile_context>
chip_gen: v7x
topology: tpu7x:2x2x1
jax: 0.10.0
libtpu: 0.0.40
codegen_flags: <defaults>
</compile_context>

<pallas_src>
import functools

import jax
import jax.numpy as jnp
from jax.experimental import pallas as pl
from jax.experimental.pallas import tpu as pltpu

# ----------------------------- configuration --------------------------------
OBS_DIM = 16
ACTION_DIM = 4
FEATURE_DIM = 32
HIDDEN_DIMS = (32, 32)
SPECTRAL_NORMS = (False, False)
LOG_STD_BOUNDS = (-10.0, 2.0)
USE_LN = True
LN_EPS = 1e-5  # PyTorch nn.LayerNorm default

# Set to jnp.bfloat16 on v6e/v7x for higher mem-bound throughput at large
# batch (loosens the 1e-5 tolerance vs the f32 reference).
MATMUL_DTYPE = jnp.float32


# ------------------------------- kernel -------------------------------------
def _actor_kernel(obs_ref, tw_ref, tb_ref, g_ref, beta_ref,
                  w1_ref, b1_ref, w2_ref, b2_ref, w3_ref, b3_ref,
                  out_ref,
                  *, action_dim, log_std_min, log_std_max, use_ln):
    # x: (OBS_DIM, TB) -- features on sublanes, batch on the 128-lane axis.
    x = obs_ref[...]

    # ---- trunk: Linear -> LayerNorm -> Tanh (or Identity) ----
    if use_ln:
        h = jnp.dot(tw_ref[...].astype(MATMUL_DTYPE), x.astype(MATMUL_DTYPE),
                    preferred_element_type=jnp.float32) + tb_ref[...]
        # LayerNorm over the feature (sublane) axis.
        mean = jnp.mean(h, axis=0, keepdims=True)                 # (1, TB)
        var = jnp.mean((h - mean) ** 2, axis=0, keepdims=True)    # (1, TB)
        h = (h - mean) * jax.lax.rsqrt(var + LN_EPS)
        h = jnp.tanh(h * g_ref[...] + beta_ref[...])              # (F, TB)
    else:
        h = x.astype(jnp.float32)

    # ---- policy MLP: (Linear -> ReLU) x 2 -> Linear ----
    h = jnp.dot(w1_ref[...].astype(MATMUL_DTYPE), h.astype(MATMUL_DTYPE),
                preferred_element_type=jnp.float32) + b1_ref[...]
    h = jnp.maximum(h, 0.0)
    h = jnp.dot(w2_ref[...].astype(MATMUL_DTYPE), h.astype(MATMUL_DTYPE),
                preferred_element_type=jnp.float32) + b2_ref[...]
    h = jnp.maximum(h, 0.0)
    out = jnp.dot(w3_ref[...].astype(MATMUL_DTYPE), h.astype(MATMUL_DTYPE),
                  preferred_element_type=jnp.float32) + b3_ref[...]  # (2A, TB)

    # ---- single lane-dense output: rows [0,A) = mu, rows [A,2A) = std ----
    # tanh bounds log_std to [log_std_min, log_std_max] BEFORE exp, so exp is
    # finite even on the discarded mu rows; jnp.where selects per row.
    row = jax.lax.broadcasted_iota(jnp.int32, out.shape, 0)
    t = jnp.tanh(out)
    log_std = log_std_min + 0.5 * (log_std_max - log_std_min) * (t + 1.0)
    out_ref[...] = jnp.where(row >= action_dim, jnp.exp(log_std), out)


# ------------------------------- wrapper -------------------------------------
def _round_up(x, m):
    return (x + m - 1) // m * m


def _choose_batch_tile(batch, batch_tile):
    # Batch is on the lane axis -> tile must be a multiple of 128.
    tb = min(batch_tile, _round_up(batch, 128))
    # v7x has 2 TensorCores: make sure the "parallel" grid axis has >= 2 steps
    # whenever there is enough work to split.  Neutral on v5e/v6e (1 TC).
    if batch > 128 and _round_up(batch, tb) // tb < 2:
        tb = max(128, _round_up((batch + 1) // 2, 128))
    return tb


def stochastic_actor_forward(obs, params, *, batch_tile=1024):
    """Returns (mu, std) — the parameters of SquashedNormal(mu, std)."""
    batch = obs.shape[0]
    out_dim = 2 * ACTION_DIM

    tb = _choose_batch_tile(batch, batch_tile)
    padded = _round_up(batch, tb)
    if padded != batch:
        obs = jnp.pad(obs, ((0, padded - batch), (0, 0)))
    # One transpose in the wrapper -> lane-dense (OBS_DIM, padded) input stream.
    obs_t = obs.T
    grid = (padded // tb,)

    kernel = functools.partial(
        _actor_kernel,
        action_dim=ACTION_DIM,
        log_std_min=LOG_STD_BOUNDS[0],
        log_std_max=LOG_STD_BOUNDS[1],
        use_ln=USE_LN,
    )

    def pin(arr):
        # Same block every grid step -> parameter stays VMEM-resident.
        return pl.BlockSpec(arr.shape, lambda i: (0, 0))

    p = params
    in_specs = [
        pl.BlockSpec((OBS_DIM, tb), lambda i: (0, i)),
        pin(p["trunk_w"]), pin(p["trunk_b"]),
        pin(p["ln_gamma"]), pin(p["ln_beta"]),
        pin(p["w1"]), pin(p["b1"]),
        pin(p["w2"]), pin(p["b2"]),
        pin(p["w3"]), pin(p["b3"]),
    ]
    out_specs = pl.BlockSpec((out_dim, tb), lambda i: (0, i))

    flops = 2 * padded * (OBS_DIM * FEATURE_DIM
                          + FEATURE_DIM * HIDDEN_DIMS[0]
                          + HIDDEN_DIMS[0] * HIDDEN_DIMS[1]
                          + HIDDEN_DIMS[1] * out_dim)
    transcendentals = padded * (FEATURE_DIM + 1 + 2 * out_dim)
    weight_bytes = sum(int(v.size) * v.dtype.itemsize for v in params.values())
    bytes_accessed = padded * (OBS_DIM + out_dim) * 4 + weight_bytes

    out = pl.pallas_call(
        kernel,
        out_shape=jax.ShapeDtypeStruct((out_dim, padded), jnp.float32),
        grid=grid,
        in_specs=in_specs,
        out_specs=out_specs,
        compiler_params=pltpu.CompilerParams(
            dimension_semantics=("parallel",)),
        cost_estimate=pl.CostEstimate(
            flops=flops,
            transcendentals=transcendentals,
            bytes_accessed=bytes_accessed),
    )(
        obs_t,
        p["trunk_w"], p["trunk_b"], p["ln_gamma"], p["ln_beta"],
        p["w1"], p["b1"], p["w2"], p["b2"], p["w3"], p["b3"],
    )
    # rows [0,A) = mu, rows [A,2A) = std; slice off padding and transpose back.
    mu = out[:ACTION_DIM, :batch].T
    std = out[ACTION_DIM:, :batch].T
    return mu, std


# --------------------------- parameter init ----------------------------------
def _linear_params(key, fan_in, fan_out):
    # Deterministic synthetic init (PyTorch-default-like uniform bound).
    # Weights kept in PyTorch [out_features, in_features] layout; biases as
    # (out_features, 1) columns for the [features, batch] kernel layout.
    kw, kb = jax.random.split(key)
    bound = 1.0 / jnp.sqrt(jnp.asarray(fan_in, jnp.float32))
    w = jax.random.uniform(kw, (fan_out, fan_in), jnp.float32, -bound, bound)
    b = jax.random.uniform(kb, (fan_out, 1), jnp.float32, -bound, bound)
    return w, b


def _maybe_sn(w, use_sn):
    # TODO(synk): PyTorch spectral_norm uses power-iteration sigma; this glue
    # uses the exact largest singular value. Disabled by SPECTRAL_NORMS here.
    if not use_sn:
        return w
    sigma = jnp.linalg.norm(w, ord=2)
    return w / sigma


def init_params(key):
    keys = jax.random.split(key, 4)
    trunk_w, trunk_b = _linear_params(keys[0], OBS_DIM, FEATURE_DIM)
    ln_gamma = jnp.ones((FEATURE_DIM, 1), jnp.float32)
    ln_beta = jnp.zeros((FEATURE_DIM, 1), jnp.float32)

    in_dim = FEATURE_DIM if USE_LN else OBS_DIM
    w1, b1 = _linear_params(keys[1], in_dim, HIDDEN_DIMS[0])
    w1 = _maybe_sn(w1, SPECTRAL_NORMS[0])
    w2, b2 = _linear_params(keys[2], HIDDEN_DIMS[0], HIDDEN_DIMS[1])
    w2 = _maybe_sn(w2, SPECTRAL_NORMS[1])
    w3, b3 = _linear_params(keys[3], HIDDEN_DIMS[1], 2 * ACTION_DIM)

    return dict(trunk_w=trunk_w, trunk_b=trunk_b,
                ln_gamma=ln_gamma, ln_beta=ln_beta,
                w1=w1, b1=b1, w2=w2, b2=b2, w3=w3, b3=b3)


# ----------------------------- pure-JAX reference ----------------------------
def reference_forward(obs, p):
    x = obs.astype(jnp.float32)
    h = x @ p["trunk_w"].T + p["trunk_b"].T
    mean = jnp.mean(h, axis=-1, keepdims=True)
    var = jnp.mean((h - mean) ** 2, axis=-1, keepdims=True)
    h = (h - mean) / jnp.sqrt(var + LN_EPS)
    h = jnp.tanh(h * p["ln_gamma"].T + p["ln_beta"].T)
    h = jnp.maximum(h @ p["w1"].T + p["b1"].T, 0.0)
    h = jnp.maximum(h @ p["w2"].T + p["b2"].T, 0.0)
    out = h @ p["w3"].T + p["b3"].T
    mu, log_std = out[:, :ACTION_DIM], out[:, ACTION_DIM:]
    log_std = jnp.tanh(log_std)
    lo, hi = LOG_STD_BOUNDS
    log_std = lo + 0.5 * (hi - lo) * (log_std + 1.0)
    return mu, jnp.exp(log_std)


# ---------------------------------- main --------------------------------------
if __name__ == "__main__":
    key = jax.random.PRNGKey(0)
    k_obs, k_params = jax.random.split(key)

    batch = 8
    obs = jax.random.normal(k_obs, (batch, OBS_DIM), jnp.float32)
    params = init_params(k_params)

    mu, std = stochastic_actor_forward(obs, params)
    mu, std = jax.block_until_ready((mu, std))

    mu_ref, std_ref = reference_forward(obs, params)
    assert mu.shape == (batch, ACTION_DIM) and std.shape == (batch, ACTION_DIM)
    assert jnp.allclose(mu, mu_ref, atol=1e-5, rtol=1e-5)
    assert jnp.allclose(std, std_ref, atol=1e-5, rtol=1e-5)

    # Also exercise a multi-step grid (non-multiple-of-tile batch) for coverage
    # of the padded path and the >=2-step (dual-TensorCore) tiling rule.
    big_batch = 1000
    obs_big = jax.random.normal(k_obs, (big_batch, OBS_DIM), jnp.float32)
    mu_b, std_b = jax.block_until_ready(
        stochastic_actor_forward(obs_big, params))
    mu_br, std_br = reference_forward(obs_big, params)
    assert jnp.allclose(mu_b, mu_br, atol=1e-5, rtol=1e-5)
    assert jnp.allclose(std_b, std_br, atol=1e-5, rtol=1e-5)

    print("KERNEL_OK")
</pallas_src>

<mosaic_0001>
module attributes {stable_mosaic.version = 11 : i64} {
  func.func @_actor_kernel(%arg0: i32, %arg1: memref<16x128xf32, #tpu.memory_space<vmem>>, %arg2: memref<32x16xf32, #tpu.memory_space<vmem>>, %arg3: memref<32x1xf32, #tpu.memory_space<vmem>>, %arg4: memref<32x1xf32, #tpu.memory_space<vmem>>, %arg5: memref<32x1xf32, #tpu.memory_space<vmem>>, %arg6: memref<32x32xf32, #tpu.memory_space<vmem>>, %arg7: memref<32x1xf32, #tpu.memory_space<vmem>>, %arg8: memref<32x32xf32, #tpu.memory_space<vmem>>, %arg9: memref<32x1xf32, #tpu.memory_space<vmem>>, %arg10: memref<8x32xf32, #tpu.memory_space<vmem>>, %arg11: memref<8x1xf32, #tpu.memory_space<vmem>>, %arg12: memref<8x128xf32, #tpu.memory_space<vmem>>) attributes {dimension_semantics = [#tpu.dimension_semantics<parallel>], iteration_bounds = array<i64: 1>, scalar_prefetch = 0 : i64, scratch_operands = 0 : i64, tpu.core_type = #tpu.core_type<tc>, window_params = [{transform_indices = @transform_0, window_bounds = array<i64: 16, 128>}, {pipeline_mode = #tpu.pipeline_mode<synchronous>, transform_indices = @transform_1, window_bounds = array<i64: 32, 16>}, {pipeline_mode = #tpu.pipeline_mode<synchronous>, transform_indices = @transform_2, window_bounds = array<i64: 32, 1>}, {pipeline_mode = #tpu.pipeline_mode<synchronous>, transform_indices = @transform_3, window_bounds = array<i64: 32, 1>}, {pipeline_mode = #tpu.pipeline_mode<synchronous>, transform_indices = @transform_4, window_bounds = array<i64: 32, 1>}, {pipeline_mode = #tpu.pipeline_mode<synchronous>, transform_indices = @transform_5, window_bounds = array<i64: 32, 32>}, {pipeline_mode = #tpu.pipeline_mode<synchronous>, transform_indices = @transform_6, window_bounds = array<i64: 32, 1>}, {pipeline_mode = #tpu.pipeline_mode<synchronous>, transform_indices = @transform_7, window_bounds = array<i64: 32, 32>}, {pipeline_mode = #tpu.pipeline_mode<synchronous>, transform_indices = @transform_8, window_bounds = array<i64: 32, 1>}, {pipeline_mode = #tpu.pipeline_mode<synchronous>, transform_indices = @transform_9, window_bounds = array<i64: 8, 32>}, {pipeline_mode = #tpu.pipeline_mode<synchronous>, transform_indices = @transform_10, window_bounds = array<i64: 8, 1>}, {transform_indices = @transform_11, window_bounds = array<i64: 8, 128>}]} {
    %c0 = arith.constant 0 : index
    %c0_0 = arith.constant 0 : index
    %0 = vector.load %arg1[%c0, %c0_0] : memref<16x128xf32, #tpu.memory_space<vmem>>, vector<16x128xf32>
    %c0_1 = arith.constant 0 : index
    %c0_2 = arith.constant 0 : index
    %1 = vector.load %arg2[%c0_1, %c0_2] : memref<32x16xf32, #tpu.memory_space<vmem>>, vector<32x16xf32>
    %cst = arith.constant dense<0.000000e+00> : vector<32x128xf32>
    %2 = tpu.matmul %1, %0, %cst {dimension_numbers = #tpu.dot_dimension_numbers<[1], [0], [0], [1], [0, 0, 1, 1], [], []>} : vector<32x16xf32>, vector<16x128xf32>, vector<32x128xf32> -> vector<32x128xf32>
    %c0_3 = arith.constant 0 : index
    %c0_4 = arith.constant 0 : index
    %3 = vector.load %arg3[%c0_3, %c0_4] : memref<32x1xf32, #tpu.memory_space<vmem>>, vector<32x1xf32>
    %4 = vector.broadcast %3 : vector<32x1xf32> to vector<32x128xf32>
    %5 = arith.addf %2, %4 : vector<32x128xf32>
    %cst_5 = arith.constant dense<0.000000e+00> : vector<128xf32>
    %6 = vector.multi_reduction <add>, %5, %cst_5 [0] : vector<32x128xf32> to vector<128xf32>
    %7 = vector.shape_cast %6 : vector<128xf32> to vector<1x128xf32>
    %cst_6 = arith.constant 3.200000e+01 : f32
    %8 = vector.broadcast %cst_6 : f32 to vector<1x128xf32>
    %9 = arith.divf %7, %8 : vector<1x128xf32>
    %10 = vector.broadcast %9 : vector<1x128xf32> to vector<32x128xf32>
    %11 = arith.subf %5, %10 : vector<32x128xf32>
    %12 = arith.mulf %11, %11 : vector<32x128xf32>
    %cst_7 = arith.constant dense<0.000000e+00> : vector<128xf32>
    %13 = vector.multi_reduction <add>, %12, %cst_7 [0] : vector<32x128xf32> to vector<128xf32>
    %14 = vector.shape_cast %13 : vector<128xf32> to vector<1x128xf32>
    %cst_8 = arith.constant 3.200000e+01 : f32
    %15 = vector.broadcast %cst_8 : f32 to vector<1x128xf32>
    %16 = arith.divf %14, %15 : vector<1x128xf32>
    %17 = vector.broadcast %9 : vector<1x128xf32> to vector<32x128xf32>
    %18 = arith.subf %5, %17 : vector<32x128xf32>
    %cst_9 = arith.constant 9.99999974E-6 : f32
    %19 = vector.broadcast %cst_9 : f32 to vector<1x128xf32>
    %20 = arith.addf %16, %19 : vector<1x128xf32>
    %21 = math.rsqrt %20 : vector<1x128xf32>
    %22 = vector.broadcast %21 : vector<1x128xf32> to vector<32x128xf32>
    %23 = arith.mulf %18, %22 : vector<32x128xf32>
    %c0_10 = arith.constant 0 : index
    %c0_11 = arith.constant 0 : index
    %24 = vector.load %arg4[%c0_10, %c0_11] : memref<32x1xf32, #tpu.memory_space<vmem>>, vector<32x1xf32>
    %25 = vector.broadcast %24 : vector<32x1xf32> to vector<32x128xf32>
    %26 = arith.mulf %23, %25 : vector<32x128xf32>
    %c0_12 = arith.constant 0 : index
    %c0_13 = arith.constant 0 : index
    %27 = vector.load %arg5[%c0_12, %c0_13] : memref<32x1xf32, #tpu.memory_space<vmem>>, vector<32x1xf32>
    %28 = vector.broadcast %27 : vector<32x1xf32> to vector<32x128xf32>
    %29 = arith.addf %26, %28 : vector<32x128xf32>
    %30 = math.tanh %29 : vector<32x128xf32>
    %c0_14 = arith.constant 0 : index
    %c0_15 = arith.constant 0 : index
    %31 = vector.load %arg6[%c0_14, %c0_15] : memref<32x32xf32, #tpu.memory_space<vmem>>, vector<32x32xf32>
    %cst_16 = arith.constant dense<0.000000e+00> : vector<32x128xf32>
    %32 = tpu.matmul %31, %30, %cst_16 {dimension_numbers = #tpu.dot_dimension_numbers<[1], [0], [0], [1], [0, 0, 1, 1], [], []>} : vector<32x32xf32>, vector<32x128xf32>, vector<32x128xf32> -> vector<32x128xf32>
    %c0_17 = arith.constant 0 : index
    %c0_18 = arith.constant 0 : index
    %33 = vector.load %arg7[%c0_17, %c0_18] : memref<32x1xf32, #tpu.memory_space<vmem>>, vector<32x1xf32>
    %34 = vector.broadcast %33 : vector<32x1xf32> to vector<32x128xf32>
    %35 = arith.addf %32, %34 : vector<32x128xf32>
    %cst_19 = arith.constant 0.000000e+00 : f32
    %36 = vector.broadcast %cst_19 : f32 to vector<32x128xf32>
    %37 = arith.maximumf %35, %36 : vector<32x128xf32>
    %c0_20 = arith.constant 0 : index
    %c0_21 = arith.constant 0 : index
    %38 = vector.load %arg8[%c0_20, %c0_21] : memref<32x32xf32, #tpu.memory_space<vmem>>, vector<32x32xf32>
    %cst_22 = arith.constant dense<0.000000e+00> : vector<32x128xf32>
    %39 = tpu.matmul %38, %37, %cst_22 {dimension_numbers = #tpu.dot_dimension_numbers<[1], [0], [0], [1], [0, 0, 1, 1], [], []>} : vector<32x32xf32>, vector<32x128xf32>, vector<32x128xf32> -> vector<32x128xf32>
    %c0_23 = arith.constant 0 : index
    %c0_24 = arith.constant 0 : index
    %40 = vector.load %arg9[%c0_23, %c0_24] : memref<32x1xf32, #tpu.memory_space<vmem>>, vector<32x1xf32>
    %41 = vector.broadcast %40 : vector<32x1xf32> to vector<32x128xf32>
    %42 = arith.addf %39, %41 : vector<32x128xf32>
    %cst_25 = arith.constant 0.000000e+00 : f32
    %43 = vector.broadcast %cst_25 : f32 to vector<32x128xf32>
    %44 = arith.maximumf %42, %43 : vector<32x128xf32>
    %c0_26 = arith.constant 0 : index
    %c0_27 = arith.constant 0 : index
    %45 = vector.load %arg10[%c0_26, %c0_27] : memref<8x32xf32, #tpu.memory_space<vmem>>, vector<8x32xf32>
    %cst_28 = arith.constant dense<0.000000e+00> : vector<8x128xf32>
    %46 = tpu.matmul %45, %44, %cst_28 {dimension_numbers = #tpu.dot_dimension_numbers<[1], [0], [0], [1], [0, 0, 1, 1], [], []>} : vector<8x32xf32>, vector<32x128xf32>, vector<8x128xf32> -> vector<8x128xf32>
    %c0_29 = arith.constant 0 : index
    %c0_30 = arith.constant 0 : index
    %47 = vector.load %arg11[%c0_29, %c0_30] : memref<8x1xf32, #tpu.memory_space<vmem>>, vector<8x1xf32>
    %48 = vector.broadcast %47 : vector<8x1xf32> to vector<8x128xf32>
    %49 = arith.addf %46, %48 : vector<8x128xf32>
    %50 = tpu.iota {dimensions = array<i32: 0>} : vector<8x128xi32>
    %51 = math.tanh %49 : vector<8x128xf32>
    %cst_31 = arith.constant 1.000000e+00 : f32
    %52 = vector.broadcast %cst_31 : f32 to vector<8x128xf32>
    %53 = arith.addf %51, %52 : vector<8x128xf32>
    %cst_32 = arith.constant 6.000000e+00 : f32
    %54 = vector.broadcast %cst_32 : f32 to vector<8x128xf32>
    %55 = arith.mulf %54, %53 : vector<8x128xf32>
    %cst_33 = arith.constant -1.000000e+01 : f32
    %56 = vector.broadcast %cst_33 : f32 to vector<8x128xf32>
    %57 = arith.addf %56, %55 : vector<8x128xf32>
    %c4_i32 = arith.constant 4 : i32
    %58 = vector.broadcast %c4_i32 : i32 to vector<8x128xi32>
    %59 = arith.cmpi sge, %50, %58 : vector<8x128xi32>
    %60 = math.exp %57 : vector<8x128xf32>
    %61 = arith.select %59, %60, %49 : vector<8x128xi1>, vector<8x128xf32>
    %c0_34 = arith.constant 0 : index
    %c0_35 = arith.constant 0 : index
    %62 = vector.load %arg12[%c0_34, %c0_35] : memref<8x128xf32, #tpu.memory_space<vmem>>, vector<8x128xf32>
    tpu.vector_store %arg12[%c0_34, %c0_35], %61 {strides = array<i32>} : memref<8x128xf32, #tpu.memory_space<vmem>>, vector<8x128xf32>,
    return
  }
  func.func @transform_0(%arg0: i32) -> (i32, i32) {
    %c0_i32 = arith.constant 0 : i32
    %c0_i32_0 = arith.constant 0 : i32
    return %c0_i32, %arg0 : i32, i32
  }
  func.func @transform_1(%arg0: i32) -> (i32, i32) {
    %c0_i32 = arith.constant 0 : i32
    %c0_i32_0 = arith.constant 0 : i32
    %c0_i32_1 = arith.constant 0 : i32
    return %c0_i32, %c0_i32_0 : i32, i32
  }
  func.func @transform_2(%arg0: i32) -> (i32, i32) {
    %c0_i32 = arith.constant 0 : i32
    %c0_i32_0 = arith.constant 0 : i32
    %c0_i32_1 = arith.constant 0 : i32
    return %c0_i32, %c0_i32_0 : i32, i32
  }
  func.func @transform_3(%arg0: i32) -> (i32, i32) {
    %c0_i32 = arith.constant 0 : i32
    %c0_i32_0 = arith.constant 0 : i32
    %c0_i32_1 = arith.constant 0 : i32
    return %c0_i32, %c0_i32_0 : i32, i32
  }
  func.func @transform_4(%arg0: i32) -> (i32, i32) {
    %c0_i32 = arith.constant 0 : i32
    %c0_i32_0 = arith.constant 0 : i32
    %c0_i32_1 = arith.constant 0 : i32
    return %c0_i32, %c0_i32_0 : i32, i32
  }
  func.func @transform_5(%arg0: i32) -> (i32, i32) {
    %c0_i32 = arith.constant 0 : i32
    %c0_i32_0 = arith.constant 0 : i32
    %c0_i32_1 = arith.constant 0 : i32
    return %c0_i32, %c0_i32_0 : i32, i32
  }
  func.func @transform_6(%arg0: i32) -> (i32, i32) {
    %c0_i32 = arith.constant 0 : i32
    %c0_i32_0 = arith.constant 0 : i32
    %c0_i32_1 = arith.constant 0 : i32
    return %c0_i32, %c0_i32_0 : i32, i32
  }
  func.func @transform_7(%arg0: i32) -> (i32, i32) {
    %c0_i32 = arith.constant 0 : i32
    %c0_i32_0 = arith.constant 0 : i32
    %c0_i32_1 = arith.constant 0 : i32
    return %c0_i32, %c0_i32_0 : i32, i32
  }
  func.func @transform_8(%arg0: i32) -> (i32, i32) {
    %c0_i32 = arith.constant 0 : i32
    %c0_i32_0 = arith.constant 0 : i32
    %c0_i32_1 = arith.constant 0 : i32
    return %c0_i32, %c0_i32_0 : i32, i32
  }
  func.func @transform_9(%arg0: i32) -> (i32, i32) {
    %c0_i32 = arith.constant 0 : i32
    %c0_i32_0 = arith.constant 0 : i32
    %c0_i32_1 = arith.constant 0 : i32
    return %c0_i32, %c0_i32_0 : i32, i32
  }
  func.func @transform_10(%arg0: i32) -> (i32, i32) {
    %c0_i32 = arith.constant 0 : i32
    %c0_i32_0 = arith.constant 0 : i32
    %c0_i32_1 = arith.constant 0 : i32
    return %c0_i32, %c0_i32_0 : i32, i32
  }
  func.func @transform_11(%arg0: i32) -> (i32, i32) {
    %c0_i32 = arith.constant 0 : i32
    %c0_i32_0 = arith.constant 0 : i32
    return %c0_i32, %arg0 : i32, i32
  }
}

</mosaic_0001>

<bundles_post_ra>
// kernel: tpu_custom_call.1
= control target key start
LH: loop header
LB: loop body
LE: loop exit
PB: predicated region body
PF: predicated region fallthrough
CT: control target
= control target key end

     0   :  { %vm69_vm0 = vcmask 130048   ;;  %v786_v4 = vmov 0   ;;  %s984_s0 = inlined_call_operand.vmem [shape: f32[16,128], index: 0, kind: input, shape index: {}]   ;;  %s985_s1 = inlined_call_operand.vmem [shape: f32[32,16], index: 1, kind: input, shape index: {}]   ;;  %s986_s2 = inlined_call_operand.vmem [shape: f32[32,1], index: 2, kind: input, shape index: {}]   ;;  %s987_s3 = inlined_call_operand.vmem [shape: f32[32,1], index: 3, kind: input, shape index: {}]   ;;  %s988_s4 = inlined_call_operand.vmem [shape: f32[32,1], index: 4, kind: input, shape index: {}]   ;;  %s989_s5 = inlined_call_operand.vmem [shape: f32[32,32], index: 5, kind: input, shape index: {}]   ;;  %s990_s6 = inlined_call_operand.vmem [shape: f32[32,1], index: 6, kind: input, shape index: {}]   ;;  %s991_s7 = inlined_call_operand.vmem [shape: f32[32,32], index: 7, kind: input, shape index: {}]   ;;  %s992_s8 = inlined_call_operand.vmem [shape: f32[32,1], index: 8, kind: input, shape index: {}]   ;;  %s993_s9 = inlined_call_operand.vmem [shape: f32[8,32], index: 9, kind: input, shape index: {}]   ;;  %s994_s10 = inlined_call_operand.vmem [shape: f32[8,1], index: 10, kind: input, shape index: {}]   ;;  %s995_s11 = inlined_call_operand.hbm [shape: f32[8,128], index: 11, kind: output, shape index: {}]  }
   0x1   :  { %v39_v0 = vld [vmem:[%s984_s0] sm:$0xff]  ;;  %v40_v1 = vld [vmem:[%s984_s0 + $0x8] sm:$0xff]  ;;  %746 = vset.pattern.permute.xlu0 %v786_v4  ;;  %747 = vset.pattern.permute.xlu1 %v786_v4  ;;  %v47_v6 = vld [vmem:[%s986_s2 + $0x10] sm:$0xff] }
   0x2   :  { %v41_v2 = vld [vmem:[%s985_s1] sm:$0xff]  ;;  %v715_v3 = vpack.c.bf16 %v40_v1, %v39_v0  ;;  %v42_v7 = vld [vmem:[%s985_s1 + $0x8] sm:$0xff]  ;;  %61 = vperm.xlu1 %747, %v47_v6   ;;  %v43_v9 = vld [vmem:[%s985_s1 + $0x10] sm:$0xff] }
   0x3   :  { %670 = vmatprep.mubr.msk.f32.mxu0 %vm69_vm0, %v41_v2  ;;  %v45_v5 = vld [vmem:[%s986_s2] sm:$0xff]  ;;  %v46_v8 = vld [vmem:[%s986_s2 + $0x8] sm:$0xff]  ;;  %v48_v10 = vld [vmem:[%s986_s2 + $0x18] sm:$0xff] }
   0x4   :  { %716 = vmatprep.subr.bf16.mxu0 %v715_v3  ;;  %51 = vperm.xlu0 %746, %v45_v5   ;;  %v44_v11 = vld [vmem:[%s985_s1 + $0x18] sm:$0xff]  ;;  %v202_v12 = vld [vmem:[%s987_s3] sm:$0xff]  ;;  %v203_v13 = vld [vmem:[%s987_s3 + $0x8] sm:$0xff] }
   0x5   :  { %718 = vmatpush3.bf16.msra.mxu0 %v715_v3 }
   0x6   :  { %66 = vperm.xlu1 %747, %v48_v10  }
   0x8   :  { %671 = vmatmul.mubr.msk.f32.vlgmr.msra.gmra.mrb[0].mxu0 %vm69_vm0, %v42_v7  ;;  %56 = vperm.xlu0 %746, %v46_v8  }
   0x9   :  { %673 = vmatprep.mubr.msk.f32.mxu0 %vm69_vm0, %v43_v9 }
   0xa   :  { %16 = vsyncpa [#allocation3], 0  ;;  %v230_v14 = vld [vmem:[%s988_s4] sm:$0xff]  ;;  %213 = vperm.xlu1 %747, %v203_v13   ;;  %v231_v15 = vld [vmem:[%s988_s4 + $0x8] sm:$0xff]  ;;  %vm290_vm1 = vcmask 261120   ;;  %vm788_vm2 = vmmov 0  }
   0xb   :  { %v204_v16 = vld [vmem:[%s987_s3 + $0x10] sm:$0xff]  ;;  %v205_v17 = vld [vmem:[%s987_s3 + $0x18] sm:$0xff]  ;;  %v266_v20 = vld [vmem:[%s990_s6] sm:$0xff]  ;;  %s790_s17 = smov [#allocation2]  }
   0xc   :  { %674 = vmatmul.mubr.msk.f32.gmra.mrb[2].mxu0 %vm69_vm0, %v44_v11  ;;  %208 = vperm.xlu0 %746, %v202_v12   ;;  %v232_v18 = vld [vmem:[%s988_s4 + $0x10] sm:$0xff]  ;;  %v233_v19 = vld [vmem:[%s988_s4 + $0x18] sm:$0xff]  ;;  %v267_v21 = vld [vmem:[%s990_s6 + $0x8] sm:$0xff]  ;;  %s618_s4 = sshll.u32 %s790_s17, 4  ;;  %s619_s4 = int_to_ptr.vmem [resolvable:$true] %s618_s4 }
   0xd   :  { %v268_v22 = vld [vmem:[%s990_s6 + $0x10] sm:$0xff]  ;;  %v269_v23 = vld [vmem:[%s990_s6 + $0x18] sm:$0xff]  ;;  %v396_v24 = vld [vmem:[%s992_s8] sm:$0xff]  ;;  %p767_p1 = scmp.lt.s32.totalorder %s619_s4, %s619_s4 }
   0xe   :  { %241 = vperm.xlu1 %747, %v231_v15   ;;  %v397_v25 = vld [vmem:[%s992_s8 + $0x8] sm:$0xff]  ;;  %v398_v26 = vld [vmem:[%s992_s8 + $0x10] sm:$0xff]  ;;  %v399_v27 = vld [vmem:[%s992_s8 + $0x18] sm:$0xff] }
   0xf   :  { %v522_v28 = vld [vmem:[%s994_s10] sm:$0xff] }
  0x10   :  { %236 = vperm.xlu0 %746, %v230_v14   ;;  %v262_v29 = vld [vmem:[%s989_s5] sm:$0xff] }
  0x11   :  { %684 = vmatprep.mubr.msk.f32.mxu1 %vm290_vm1, %v262_v29 }
  0x12   :  { %223 = vperm.xlu1 %747, %v205_v17  }
  0x14   :  { %218 = vperm.xlu0 %746, %v204_v16  }
  0x16   :  { %251 = vperm.xlu1 %747, %v233_v19  }
  0x18   :  { %246 = vperm.xlu0 %746, %v232_v18  }
  0x1a   :  { %277 = vperm.xlu1 %747, %v267_v21  }
  0x1c   :  { %272 = vperm.xlu0 %746, %v266_v20  }
  0x1e   :  { %287 = vperm.xlu1 %747, %v269_v23  }
  0x20   :  { %282 = vperm.xlu0 %746, %v268_v22  }
  0x22   :  { %407 = vperm.xlu1 %747, %v397_v25  }
  0x24   :  { %402 = vperm.xlu0 %746, %v396_v24  }
  0x26   :  { %417 = vperm.xlu1 %747, %v399_v27  }
  0x28   :  { %412 = vperm.xlu0 %746, %v398_v26  }
  0x2c   :  { %525 = vperm.xlu0 %746, %v522_v28  }
  0x81   :  { %v62_v33 = vpop.permute.xlu1 %61 }
  0x83   :  { %v52_v30 = vpop.permute.xlu0 %51 }
  0x85   :  { %v67_v41 = vpop.permute.xlu1 %66 }
  0x87   :  { %v57_v31 = vpop.permute.xlu0 %56 }
  0x89   :  { %v214_v7 = vpop.permute.xlu1 %213 }
  0x8b   :  { %v209_v5 = vpop.permute.xlu0 %208 }
  0x8d   :  { %v242_v10 = vpop.permute.xlu1 %241 }
  0x8f   :  { %v237_v9 = vpop.permute.xlu0 %236 }
  0x91   :  { %v224_v12 = vpop.permute.xlu1 %223 }
  0x93   :  { %v219_v11 = vpop.permute.xlu0 %218 }
  0x95   :  { %v252_v23 = vpop.permute.xlu1 %251 }
  0x97   :  { %v247_v22 = vpop.permute.xlu0 %246 }
  0xdb   :  { %v672_v32 = vpop.f32.mrb[0].mxu0 }
  0xdc   :  { %v154_v34 = vadd.f32 %v672_v32, %v57_v31  ;;  %v148_v35 = vpop.f32.mrb[1].mxu0 }
  0xdd   :  { %v149_v36 = vadd.f32 %v148_v35, %v52_v30  ;;  %v264_v35 = vld [vmem:[%s989_s5 + $0x10] sm:$0xff] }
  0xdf   :  { %v167_v37 = vadd.f32 %v154_v34, %v149_v36  ;;  %v675_v38 = vpop.f32.mrb[2].mxu0 }
  0xe0   :  { %v158_v39 = vpop.f32.mrb[3].mxu0  ;;  %v164_v42 = vadd.f32 %v675_v38, %v67_v41  ;;  %v278_v38 = vpop.permute.xlu1 %277 }
  0xe1   :  { %v159_v40 = vadd.f32 %v158_v39, %v62_v33  ;;  %v273_v39 = vpop.permute.xlu0 %272 }
  0xe3   :  { %v168_v43 = vadd.f32 %v167_v37, %v159_v40  ;;  %v392_v37 = vld [vmem:[%s991_s7] sm:$0xff] }
  0xe4   :  { %698 = vmatprep.mubr.msk.f32.mxu0 %vm290_vm1, %v392_v37 }
  0xe5   :  { %v169_v44 = vadd.f32 %v168_v43, %v164_v42 }
  0xe7   :  { %v170_v45 = vrot.slane %v169_v44, 4 }
  0xe9   :  { %v171_v46 = vadd.f32 %v170_v45, %v169_v44  ;;  %v288_v45 = vpop.permute.xlu1 %287 }
  0xeb   :  { %v172_v47 = vrot.slane %v171_v46, 2 }
  0xed   :  { %v173_v48 = vadd.f32 %v172_v47, %v171_v46 }
  0xef   :  { %v174_v49 = vrot.slane %v173_v48, 1 }
  0xf1   :  { %v175_v50 = vadd.f32 %v174_v49, %v173_v48  ;;  %v283_v48 = vpop.permute.xlu0 %282 }
  0xf3   :  { %v177_v51 = vmul.f32 0.03125, %v175_v50 }
  0xf5   :  { %v178_v52 = vsub.f32 %v149_v36, %v177_v51  ;;  %v179_v53 = vsub.f32 %v154_v34, %v177_v51  ;;  %v180_v54 = vsub.f32 %v159_v40, %v177_v51  ;;  %v181_v55 = vsub.f32 %v164_v42, %v177_v51  ;;  %v263_v34 = vld [vmem:[%s989_s5 + $0x8] sm:$0xff]  ;;  %v265_v36 = vld [vmem:[%s989_s5 + $0x18] sm:$0xff] }
  0xf7   :  { %v182_v56 = vmul.f32 %v178_v52, %v178_v52  ;;  %v183_v57 = vmul.f32 %v179_v53, %v179_v53  ;;  %v184_v58 = vmul.f32 %v180_v54, %v180_v54  ;;  %v185_v60 = vmul.f32 %v181_v55, %v181_v55 }
  0xf9   :  { %v186_v59 = vadd.f32 %v183_v57, %v182_v56  ;;  %v393_v56 = vld [vmem:[%s991_s7 + $0x8] sm:$0xff]  ;;  %v394_v57 = vld [vmem:[%s991_s7 + $0x10] sm:$0xff] }
  0xfb   :  { %v187_v61 = vadd.f32 %v186_v59, %v184_v58  ;;  %v395_v58 = vld [vmem:[%s991_s7 + $0x18] sm:$0xff]  ;;  %v787_v59 = vmov 0.0|0.0  }
  0xfd   :  { %v188_v62 = vadd.f32 %v187_v61, %v185_v60  ;;  %v789_v60 = vmov 0.0   ;;  %v408_v61 = vpop.permute.xlu1 %407 }
  0xff   :  { %v189_v63 = vrot.slane %v188_v62, 4 }
 0x101   :  { %v190_v0 = vadd.f32 %v189_v63, %v188_v62  ;;  %v403_v62 = vpop.permute.xlu0 %402 }
 0x103   :  { %v191_v1 = vrot.slane %v190_v0, 2 }
 0x105   :  { %v192_v2 = vadd.f32 %v191_v1, %v190_v0 }
 0x107   :  { %v193_v3 = vrot.slane %v192_v2, 1 }
 0x109   :  { %v194_v4 = vadd.f32 %v193_v3, %v192_v2 }
 0x10b   :  { %v195_v6 = vmul.f32 0.03125, %v194_v4  ;;  %v418_v4 = vpop.permute.xlu1 %417 }
 0x10d   :  { %v196_v8 = vadd.f32 1e-05, %v195_v6 }
 0x10f   :  { %748 = vrsqrt.f32 %v196_v8 }
 0x119   :  { %v749_v13 = vpop.eup %748 }
 0x11a   :  { %v198_v14 = vmul.f32 %v749_v13, %v178_v52  ;;  %v199_v15 = vmul.f32 %v749_v13, %v179_v53  ;;  %v200_v16 = vmul.f32 %v749_v13, %v180_v54  ;;  %v201_v17 = vmul.f32 %v749_v13, %v181_v55 }
 0x11c   :  { %v228_v18 = vmul.f32 %v219_v11, %v200_v16  ;;  %v229_v19 = vmul.f32 %v224_v12, %v201_v17  ;;  %v226_v20 = vmul.f32 %v209_v5, %v198_v14  ;;  %v227_v21 = vmul.f32 %v214_v7, %v199_v15  ;;  %v413_v7 = vpop.permute.xlu0 %412  ;;  %v521_v15 = vld [vmem:[%s993_s9] sm:$0xff]  ;;  %s762_s9 = scalar_lea.vmem %s619_s4, 128 }
 0x11d   :  { %p763_p0 = scmp.ne.s32.totalorder %s619_s4, %s762_s9  ;;  %p768_p2 = scmp.lt.s32.totalorder %s762_s9, %s762_s9 }
 0x11e   :  { %v256_v24 = vadd.f32 %v247_v22, %v228_v18  ;;  %v254_v25 = vadd.f32 %v237_v9, %v226_v20  ;;  %v255_v26 = vadd.f32 %v242_v10, %v227_v21  ;;  %v257_v27 = vadd.f32 %v252_v23, %v229_v19 }
 0x11f   :  { %p769_p3 = por %p768_p2, %p767_p1 }
 0x120   :  { %750 = vtanh.f32 %v256_v24  ;;  %v526_v16 = vpop.permute.xlu0 %525 }
 0x121   :  { %752 = vtanh.f32 %v254_v25  ;;  %v601_v25 = vlaneseq  ;;  %p770_p4 = pnand %p769_p3, %p763_p0 }
 0x122   :  { %754 = vtanh.f32 %v255_v26 }
 0x123   :  { %756 = vtanh.f32 %v257_v27  ;;  %v602_v26 = vshrl.u32 %v601_v25, 7 }
 0x125   :  { %vm607_vm3 = vcmp.ge.s32.totalorder %v602_v26, 4 }
 0x12a   :  { %v751_v28 = vpop.eup %750 }
 0x12b   :  { %v753_v29 = vpop.eup %752 }
 0x12c   :  { %v755_v30 = vpop.eup %754 }
 0x12d   :  { %v757_v31 = vpop.eup %756  ;;  %v719_v32 = vpack.c.bf16 %v755_v30, %v753_v29 }
 0x12e   :  { %v723_v33 = vpack.c.bf16 %v757_v31, %v751_v28 }
 0x12f   :  { %720 = vmatprep.subr.bf16.mxu1 %v719_v32 }
 0x130   :  { %722 = vmatpush3.bf16.msra.mxu1 %v719_v32 }
 0x131   :  { %724 = vmatprep.subr.bf16.mxu1 %v723_v33 }
 0x134   :  { %726 = vmatpush3.bf16.msra.mxu1 %v723_v33 }
 0x135   :  { %735 = vmatprep.subr.bf16.mxu1 %v787_v59 }
 0x137   :  { %685 = vmatmul.mubr.msk.f32.vlgmr.msra.gmra.mrb[0].mxu1 %vm290_vm1, %v263_v34 }
 0x138   :  { %687 = vmatprep.mubr.msk.f32.mxu1 %vm290_vm1, %v264_v35 }
 0x13b   :  { %688 = vmatmul.mubr.msk.f32.gmra.mrb[2].mxu1 %vm290_vm1, %v265_v36 }
 0x13c   :  { %712 = vmatprep.mubr.msk.f32.mxu1 %vm788_vm2, %v789_v60 }
 0x20a   :  { %v686_v40 = vpop.f32.mrb[0].mxu1 }
 0x20b   :  { %v375_v41 = vadd.f32 %v686_v40, %v278_v38  ;;  %v369_v42 = vpop.f32.mrb[1].mxu1 }
 0x20c   :  { %v370_v43 = vadd.f32 %v369_v42, %v273_v39 }
 0x20d   :  { %v389_v44 = vmax.f32 %v375_v41, 0.0 }
 0x20e   :  { %v388_v46 = vmax.f32 %v370_v43, 0.0  ;;  %v689_v47 = vpop.f32.mrb[2].mxu1 }
 0x20f   :  { %v385_v49 = vadd.f32 %v689_v47, %v288_v45  ;;  %v379_v50 = vpop.f32.mrb[3].mxu1 }
 0x210   :  { %v727_v51 = vpack.c.bf16 %v389_v44, %v388_v46  ;;  %v380_v52 = vadd.f32 %v379_v50, %v283_v48 }
 0x211   :  { %v391_v53 = vmax.f32 %v385_v49, 0.0 }
 0x212   :  { %v390_v54 = vmax.f32 %v380_v52, 0.0  ;;  %728 = vmatprep.subr.bf16.mxu0 %v727_v51 }
 0x213   :  { %730 = vmatpush3.bf16.msra.mxu0 %v727_v51 }
 0x214   :  { %v731_v55 = vpack.c.bf16 %v391_v53, %v390_v54 }
 0x216   :  { %732 = vmatprep.subr.bf16.mxu0 %v731_v55 }
 0x217   :  { %734 = vmatpush3.bf16.msra.mxu0 %v731_v55 }
 0x21a   :  { %699 = vmatmul.mubr.msk.f32.vlgmr.msra.gmra.mrb[4].mxu0 %vm290_vm1, %v393_v56 }
 0x21b   :  { %701 = vmatprep.mubr.msk.f32.mxu0 %vm290_vm1, %v394_v57 }
 0x21e   :  { %702 = vmatmul.mubr.msk.f32.gmra.mrb[6].mxu0 %vm290_vm1, %v395_v58 }
 0x2ed   :  { %v700_v63 = vpop.f32.mrb[4].mxu0 }
 0x2ee   :  { %v504_v0 = vadd.f32 %v700_v63, %v408_v61  ;;  %v498_v1 = vpop.f32.mrb[5].mxu0 }
 0x2ef   :  { %v499_v2 = vadd.f32 %v498_v1, %v403_v62 }
 0x2f0   :  { %v518_v3 = vmax.f32 %v504_v0, 0.0 }
 0x2f1   :  { %v517_v5 = vmax.f32 %v499_v2, 0.0  ;;  %v703_v6 = vpop.f32.mrb[6].mxu0 }
 0x2f2   :  { %v514_v8 = vadd.f32 %v703_v6, %v418_v4  ;;  %v508_v9 = vpop.f32.mrb[7].mxu0 }
 0x2f3   :  { %v736_v10 = vpack.c.bf16 %v518_v3, %v517_v5  ;;  %v509_v11 = vadd.f32 %v508_v9, %v413_v7 }
 0x2f4   :  { %v520_v12 = vmax.f32 %v514_v8, 0.0 }
 0x2f5   :  { %v519_v13 = vmax.f32 %v509_v11, 0.0  ;;  %737 = vmatpush3.bf16.msra.mxu1 %v736_v10 }
 0x2f6   :  { %738 = vmatprep.subr.bf16.mxu1 %v787_v59 }
 0x2f7   :  { %v739_v14 = vpack.c.bf16 %v520_v12, %v519_v13 }
 0x2f9   :  { %740 = vmatpush3.bf16.msra.mxu1 %v739_v14 }
 0x2fc   :  { %713 = vmatmul.mubr.msk.f32.vlgmr.msra.gmra.mrb[4].mxu1 %vm290_vm1, %v521_v15 }
 0x3cf   :  { %v597_v17 = vpop.f32.mrb[4].mxu1 }
 0x3d0   :  { %v598_v18 = vadd.f32 %v597_v17, %v526_v16  ;;  %v714_v19 = vpop.f32.mrb[5].mxu1 }
 0x3d2   :  { %758 = vtanh.f32 %v598_v18 }
 0x3dc   :  { %v759_v20 = vpop.eup %758 }
 0x3dd   :  { %v604_v21 = vadd.f32 1.0, %v759_v20 }
 0x3df   :  { %v605_v22 = vmul.f32 6.0, %v604_v21 }
 0x3e1   :  { %v606_v23 = vadd.f32 -10.0, %v605_v22 }
 0x3e3   :  { %v608_v24 = vmul.f32 1.442695, %v606_v23 }
 0x3e5   :  { %760 = vpow2.f32 %v608_v24 }
 0x3ef   :  { %v761_v27 = vpop.eup %760 }
 0x3f0   :  { %v610_v28 = vsel %vm607_vm3, %v761_v27, %v598_v18 }
 0x3f1   :  { %611 = vst [vmem:[#allocation2] sm:$0xff] %v610_v28 }
 0x3f2   :  { %773 = shalt.err (!%p770_p4)
}
 0x3f3   :  { %s774_s20 = scalar_lea.hbm %s995_s11, 128 }
 0x3f4   :  { %p775_p5 = scmp.ne.s32.totalorder %s995_s11, %s774_s20  ;;  %p778_p6 = scmp.lt.u32.totalorder %s774_s20, %s995_s11 }
 0x3f6   :  { %p780_p7 = pnand %p778_p6, %p775_p5 }
 0x3f8   :  { %783 = shalt.err (!%p780_p7)
}
 0x3f9   :  { %621 = dma.vmem_to_hbm [thread:$0]  %s619_s4, 128, %s995_s11, [#allocation3]  }
 0x3fa   :  { %784 = dma.done.wait [#allocation3], 128  }
 0x3fb   :  { %785 = vsyncadd [#allocation3], 4294967168 }
 0x3fc   :  { %625 = vsyncpa [#allocation3], 1 }

</bundles_post_ra>
